<compile_context>
chip_gen: v7x
topology: tpu7x:2x2x1
jax: 0.10.0
libtpu: 0.0.40
codegen_flags: <defaults>
</compile_context>

<pallas_src>
import functools

import jax
import jax.numpy as jnp
from jax import lax
from jax.experimental import pallas as pl
from jax.experimental.pallas import tpu as pltpu


def _tpu_capacity_config():
    """Return (vmem_limit_bytes, target_slab_bytes, num_tensorcores)."""
    kind = ""
    try:
        kind = jax.devices()[0].device_kind.lower()
    except Exception:
        pass
    is_v7 = ("v7" in kind) or ("7x" in kind)

    vmem_phys = None
    try:
        vmem_phys = int(pltpu.get_tpu_info().vmem_capacity_bytes)
    except Exception:
        pass
    if vmem_phys is None:
        vmem_phys = (64 << 20) if is_v7 else (128 << 20)

    if is_v7 or vmem_phys <= (64 << 20):
        # v7x-class: 64 MiB VMEM per TensorCore, 2 TCs per chip.
        return 48 << 20, 6 << 20, 2
    # v4 / v5e / v5p / v6e: 128 MiB VMEM, single TensorCore.
    return 96 << 20, 16 << 20, 1


# ---------------------------------------------------------------------------
# Path A: fused single pass — whole image(s) resident per grid step.
# ---------------------------------------------------------------------------
def _se_fused_kernel(x_ref, w1_ref, w2_ref, o_ref, *, inv_hw):
    x = x_ref[...]                                             # (Bt, C, HW)
    # Squeeze: mean over the spatial (lane) axis, accumulated in f32.
    y = jnp.sum(x, axis=-1, dtype=jnp.float32) * inv_hw        # (Bt, C)
    # Excitation: tiny bias-free 2-layer MLP, batched over Bt.
    h = jnp.maximum(
        jnp.dot(y, w1_ref[...], preferred_element_type=jnp.float32), 0.0)
    s = jax.nn.sigmoid(
        jnp.dot(h, w2_ref[...], preferred_element_type=jnp.float32))
    # Scale: per-(b, c) gate broadcast over HW, multiplied in x's dtype so the
    # store stays in the input dtype (no full-tile f32 copy).
    o_ref[...] = x * s.astype(x.dtype)[:, :, None]


def _se_fused(x3, w1, w2, batch_block, vmem_limit):
    B, C, HW = x3.shape
    kernel = functools.partial(_se_fused_kernel, inv_hw=1.0 / HW)
    n_b = pl.cdiv(B, batch_block)          # partial last block is allowed
    return pl.pallas_call(
        kernel,
        out_shape=jax.ShapeDtypeStruct((B, C, HW), x3.dtype),
        grid_spec=pltpu.PrefetchScalarGridSpec(
            num_scalar_prefetch=0,
            grid=(n_b,),
            in_specs=[
                pl.BlockSpec((batch_block, C, HW), lambda b: (b, 0, 0)),
                pl.BlockSpec(w1.shape, lambda b: (0, 0)),
                pl.BlockSpec(w2.shape, lambda b: (0, 0)),
            ],
            out_specs=pl.BlockSpec((batch_block, C, HW), lambda b: (b, 0, 0)),
        ),
        compiler_params=pltpu.CompilerParams(
            dimension_semantics=("parallel",),
            vmem_limit_bytes=vmem_limit),
    )(x3, w1, w2)


# ---------------------------------------------------------------------------
# Path B: two passes for large feature maps.
#   Pass 1: stream x, accumulate per-(b, c) channel sums.
#   (XLA)  : run the tiny excitation MLP once, batched over all images.
#   Pass 2: stream x again and apply the per-(b, c) gate.
# ---------------------------------------------------------------------------
def _se_sum_kernel(x_ref, sum_ref, acc_ref, *, hw_total, hw_block, need_mask):
    k = pl.program_id(1)
    last = pl.num_programs(1) - 1

    @pl.when(k == 0)
    def _():
        acc_ref[...] = jnp.zeros_like(acc_ref)

    x = x_ref[...]                                             # (C, hw1)

    if need_mask:
        # Only the final (ragged) HW tile pays for the iota + select mask.
        @pl.when(k != last)
        def _():
            acc_ref[...] += jnp.sum(x, axis=-1, keepdims=True,
                                    dtype=jnp.float32)

        @pl.when(k == last)
        def _():
            pos = k * hw_block + lax.broadcasted_iota(jnp.int32, x.shape, 1)
            xm = jnp.where(pos < hw_total, x, jnp.zeros_like(x))
            acc_ref[...] += jnp.sum(xm, axis=-1, keepdims=True,
                                    dtype=jnp.float32)
    else:
        acc_ref[...] += jnp.sum(x, axis=-1, keepdims=True, dtype=jnp.float32)

    @pl.when(k == last)
    def _():
        sum_ref[...] = acc_ref[...]


def _se_scale_kernel(x_ref, gate_ref, o_ref):
    # x: (C, hw2) in input dtype, gate: (C, 1) already cast to input dtype.
    o_ref[...] = x_ref[...] * gate_ref[...]


def _round_hw_block(hw_req, hw_total):
    """Clamp an HW tile to the lane rule: multiple of 128, or the full HW."""
    hw_req = max(1, min(int(hw_req), hw_total))
    if hw_req >= hw_total or hw_total <= 128:
        return hw_total
    return max(128, (hw_req // 128) * 128)


def _se_two_pass(x3, w1, w2, *, vmem_limit, hw_block=None):
    B, C, HW = x3.shape
    itemsize = x3.dtype.itemsize
    xdtype = x3.dtype

    usable = int(vmem_limit * 0.8) - (1 << 20)
    if hw_block is None:
        # Pass 2 double-buffers input AND output slabs (4 buffers); pass 1
        # only double-buffers the input (2 buffers) -> 2x larger tile.
        hw2 = _round_hw_block(usable // (4 * C * itemsize), HW)
        hw1 = _round_hw_block(usable // (2 * C * itemsize), HW)
    else:
        hw1 = hw2 = _round_hw_block(hw_block, HW)
    # TODO(synk): for very large C (f32 C >~ 24K) even a 128-lane tile can
    # exceed the scoped VMEM limit; that regime additionally needs C tiling.

    # --- Pass 1: per-image, per-channel sums (streams x once). -------------
    n_hw1 = pl.cdiv(HW, hw1)
    need_mask = (n_hw1 * hw1) != HW
    sums = pl.pallas_call(
        functools.partial(_se_sum_kernel, hw_total=HW, hw_block=hw1,
                          need_mask=need_mask),
        out_shape=jax.ShapeDtypeStruct((B, C, 1), jnp.float32),
        grid_spec=pltpu.PrefetchScalarGridSpec(
            num_scalar_prefetch=0,
            grid=(B, n_hw1),
            in_specs=[pl.BlockSpec((None, C, hw1), lambda b, k: (b, 0, k))],
            out_specs=pl.BlockSpec((None, C, 1), lambda b, k: (b, 0, 0)),
            scratch_shapes=[pltpu.VMEM((C, 1), jnp.float32)],
        ),
        compiler_params=pltpu.CompilerParams(
            dimension_semantics=("parallel", "arbitrary"),
            vmem_limit_bytes=vmem_limit),
    )(x3)

    # --- Excitation MLP: once, batched over all B, as a plain XLA op. ------
    y = sums.reshape(B, C) * jnp.float32(1.0 / HW)
    h = jnp.maximum(jnp.dot(y, w1.astype(jnp.float32),
                            preferred_element_type=jnp.float32), 0.0)
    s = jax.nn.sigmoid(jnp.dot(h, w2.astype(jnp.float32),
                               preferred_element_type=jnp.float32))
    gate = s.astype(xdtype).reshape(B, C, 1)

    # --- Pass 2: stream x again and apply the gate. -------------------------
    n_hw2 = pl.cdiv(HW, hw2)
    return pl.pallas_call(
        _se_scale_kernel,
        out_shape=jax.ShapeDtypeStruct((B, C, HW), xdtype),
        grid_spec=pltpu.PrefetchScalarGridSpec(
            num_scalar_prefetch=0,
            grid=(B, n_hw2),
            in_specs=[
                pl.BlockSpec((None, C, hw2), lambda b, k: (b, 0, k)),
                pl.BlockSpec((None, C, 1), lambda b, k: (b, 0, 0)),
            ],
            out_specs=pl.BlockSpec((None, C, hw2), lambda b, k: (b, 0, k)),
        ),
        compiler_params=pltpu.CompilerParams(
            dimension_semantics=("parallel", "parallel"),
            vmem_limit_bytes=vmem_limit),
    )(x3, gate)


# ---------------------------------------------------------------------------
# Public wrapper.
# ---------------------------------------------------------------------------
def se_layer(x_nchw, w1, w2, *, force_two_pass=False, hw_block=None,
             batch_block=None):
    """Squeeze-and-Excitation forward.

    Args:
      x_nchw: (B, C, H, W) input (PyTorch NCHW convention).
      w1: (C, Cr)  — transpose of PyTorch fc[0].weight ((Cr, C)).
      w2: (Cr, C)  — transpose of PyTorch fc[2].weight ((C, Cr)).
      force_two_pass / hw_block / batch_block: testing hooks.
    Returns:
      (B, C, H, W) output, same dtype as x.
    """
    B, C, H, W = x_nchw.shape
    HW = H * W
    x3 = x_nchw.reshape(B, C, HW)          # free view; NCHW layout unchanged
    per_image_bytes = C * HW * x3.dtype.itemsize

    vmem_limit, target_slab, num_tc = _tpu_capacity_config()

    # Fused path keeps 2 input + 2 output pipeline buffers plus the (double-
    # buffered) weights resident; budget against the generation's VMEM limit.
    weights_bytes = 2 * (w1.size * w1.dtype.itemsize +
                         w2.size * w2.dtype.itemsize)
    usable = int(vmem_limit * 0.8) - weights_bytes - (1 << 20)
    fused_ok = (not force_two_pass) and (4 * per_image_bytes <= usable)

    if fused_ok:
        if batch_block is None:
            bt_vmem = max(1, usable // (4 * per_image_bytes))
            bt_tgt = max(1, target_slab // per_image_bytes)
            batch_block = max(1, min(B, bt_vmem, bt_tgt))
            if num_tc >= 2 and B >= 2:
                # v7x megacore only: keep >= 2 (and an even number of)
                # "parallel" grid steps so both TensorCores stay busy.
                batch_block = min(batch_block, pl.cdiv(B, 2))
                steps = pl.cdiv(B, batch_block)
                if steps > 1 and steps % 2 != 0:
                    batch_block = pl.cdiv(B, steps + 1)
        out3 = _se_fused(x3, w1, w2, batch_block, vmem_limit)
    else:
        out3 = _se_two_pass(x3, w1, w2, vmem_limit=vmem_limit,
                            hw_block=hw_block)

    # TODO(synk): when HW is not a multiple of 128 (e.g. 7x7 late-CNN SE) the
    # last block dim is lane-sparse; folding (C, HW) onto the lane axis needs
    # an in-kernel relayout (value reshape) and is left as future work.
    return out3.reshape(B, C, H, W)


def _reference(x_nchw, w1, w2):
    # Plain-JAX reference mirroring the PyTorch forward.
    y = jnp.mean(x_nchw.astype(jnp.float32), axis=(2, 3))           # (B, C)
    h = jnp.maximum(y @ w1, 0.0)
    s = jax.nn.sigmoid(h @ w2)                                      # (B, C)
    return (x_nchw.astype(jnp.float32) * s[:, :, None, None]).astype(
        x_nchw.dtype)


if __name__ == "__main__":
    # Small shapes consistent with the module: channel=32, reduction=16 -> Cr=2.
    B, C, H, W = 2, 32, 16, 16
    reduction = 16
    Cr = C // reduction

    key = jax.random.PRNGKey(0)
    kx, k1, k2, kx2, kx3 = jax.random.split(key, 5)

    x = jax.random.normal(kx, (B, C, H, W), dtype=jnp.float32)
    # Deterministic bias-free Linear weights (Kaiming-uniform-ish scale).
    w1 = jax.random.uniform(k1, (C, Cr), minval=-1.0, maxval=1.0,
                            dtype=jnp.float32) / jnp.sqrt(C)
    w2 = jax.random.uniform(k2, (Cr, C), minval=-1.0, maxval=1.0,
                            dtype=jnp.float32) / jnp.sqrt(Cr)

    ref = _reference(x, w1, w2)

    # 1) Fused single-pass path (default for small / medium feature maps).
    out = jax.block_until_ready(se_layer(x, w1, w2))
    assert out.shape == (B, C, H, W)
    assert jnp.allclose(out, ref, atol=1e-5, rtol=1e-5)

    # 2) Fused path with a partial (cdiv) final batch block: B=3, block of 2.
    x_odd = jax.random.normal(kx2, (3, C, H, W), dtype=jnp.float32)
    ref_odd = _reference(x_odd, w1, w2)
    out_odd = jax.block_until_ready(se_layer(x_odd, w1, w2, batch_block=2))
    assert jnp.allclose(out_odd, ref_odd, atol=1e-5, rtol=1e-5)

    # 3) Two-pass path (used for feature maps too large for the fused VMEM
    #    budget), forced here with 128-lane HW tiles (HW = 256 -> 2 tiles).
    out_2p = jax.block_until_ready(
        se_layer(x, w1, w2, force_two_pass=True, hw_block=128))
    assert jnp.allclose(out_2p, ref, atol=1e-5, rtol=1e-5)

    # 4) Two-pass path with a ragged final HW tile (HW = 12*12 = 144):
    #    exercises the last-tile-only mask and OOB-write dropping.
    x_rag = jax.random.normal(kx3, (B, C, 12, 12), dtype=jnp.float32)
    ref_rag = _reference(x_rag, w1, w2)
    out_rag = jax.block_until_ready(
        se_layer(x_rag, w1, w2, force_two_pass=True, hw_block=128))
    assert jnp.allclose(out_rag, ref_rag, atol=1e-5, rtol=1e-5)

    print("KERNEL_OK")
</pallas_src>

<mosaic_0001>
module attributes {stable_mosaic.version = 11 : i64} {
  func.func @_se_fused_kernel(%arg0: i32, %arg1: memref<2x32x256xf32, #tpu.memory_space<vmem>>, %arg2: memref<32x2xf32, #tpu.memory_space<vmem>>, %arg3: memref<2x32xf32, #tpu.memory_space<vmem>>, %arg4: memref<2x32x256xf32, #tpu.memory_space<vmem>>) attributes {dimension_semantics = [#tpu.dimension_semantics<parallel>], iteration_bounds = array<i64: 1>, scalar_prefetch = 0 : i64, scratch_operands = 0 : i64, tpu.core_type = #tpu.core_type<tc>, window_params = [{transform_indices = @transform_0, window_bounds = array<i64: 2, 32, 256>}, {pipeline_mode = #tpu.pipeline_mode<synchronous>, transform_indices = @transform_1, window_bounds = array<i64: 32, 2>}, {pipeline_mode = #tpu.pipeline_mode<synchronous>, transform_indices = @transform_2, window_bounds = array<i64: 2, 32>}, {transform_indices = @transform_3, window_bounds = array<i64: 2, 32, 256>}]} {
    %c0 = arith.constant 0 : index
    %c0_0 = arith.constant 0 : index
    %c0_1 = arith.constant 0 : index
    %0 = vector.load %arg1[%c0, %c0_0, %c0_1] : memref<2x32x256xf32, #tpu.memory_space<vmem>>, vector<2x32x256xf32>
    %cst = arith.constant dense<0.000000e+00> : vector<2x32xf32>
    %1 = vector.multi_reduction <add>, %0, %cst [2] : vector<2x32x256xf32> to vector<2x32xf32>
    %cst_2 = arith.constant 3.906250e-03 : f32
    %2 = vector.broadcast %cst_2 : f32 to vector<2x32xf32>
    %3 = arith.mulf %1, %2 : vector<2x32xf32>
    %c0_3 = arith.constant 0 : index
    %c0_4 = arith.constant 0 : index
    %4 = vector.load %arg2[%c0_3, %c0_4] : memref<32x2xf32, #tpu.memory_space<vmem>>, vector<32x2xf32>
    %cst_5 = arith.constant dense<0.000000e+00> : vector<2x2xf32>
    %5 = tpu.matmul %3, %4, %cst_5 {dimension_numbers = #tpu.dot_dimension_numbers<[1], [0], [0], [1], [0, 0, 1, 1], [], []>} : vector<2x32xf32>, vector<32x2xf32>, vector<2x2xf32> -> vector<2x2xf32>
    %cst_6 = arith.constant 0.000000e+00 : f32
    %6 = vector.broadcast %cst_6 : f32 to vector<2x2xf32>
    %7 = arith.maximumf %5, %6 : vector<2x2xf32>
    %c0_7 = arith.constant 0 : index
    %c0_8 = arith.constant 0 : index
    %8 = vector.load %arg3[%c0_7, %c0_8] : memref<2x32xf32, #tpu.memory_space<vmem>>, vector<2x32xf32>
    %cst_9 = arith.constant dense<0.000000e+00> : vector<2x32xf32>
    %9 = tpu.matmul %7, %8, %cst_9 {dimension_numbers = #tpu.dot_dimension_numbers<[1], [0], [0], [1], [0, 0, 1, 1], [], []>} : vector<2x2xf32>, vector<2x32xf32>, vector<2x32xf32> -> vector<2x32xf32>
    %10 = arith.negf %9 : vector<2x32xf32>
    %11 = math.exp %10 : vector<2x32xf32>
    %cst_10 = arith.constant 1.000000e+00 : f32
    %12 = vector.broadcast %cst_10 : f32 to vector<2x32xf32>
    %13 = arith.addf %12, %11 : vector<2x32xf32>
    %14 = arith.divf %12, %13 : vector<2x32xf32>
    %15 = vector.shape_cast %14 : vector<2x32xf32> to vector<2x32x1xf32>
    %16 = vector.broadcast %15 : vector<2x32x1xf32> to vector<2x32x256xf32>
    %17 = arith.mulf %0, %16 : vector<2x32x256xf32>
    %c0_11 = arith.constant 0 : index
    %c0_12 = arith.constant 0 : index
    %c0_13 = arith.constant 0 : index
    %18 = vector.load %arg4[%c0_11, %c0_12, %c0_13] : memref<2x32x256xf32, #tpu.memory_space<vmem>>, vector<2x32x256xf32>
    tpu.vector_store %arg4[%c0_11, %c0_12, %c0_13], %17 {strides = array<i32>} : memref<2x32x256xf32, #tpu.memory_space<vmem>>, vector<2x32x256xf32>,
    return
  }
  func.func @transform_0(%arg0: i32) -> (i32, i32, i32) {
    %c0_i32 = arith.constant 0 : i32
    %c0_i32_0 = arith.constant 0 : i32
    %c0_i32_1 = arith.constant 0 : i32
    return %arg0, %c0_i32, %c0_i32_0 : i32, i32, i32
  }
  func.func @transform_1(%arg0: i32) -> (i32, i32) {
    %c0_i32 = arith.constant 0 : i32
    %c0_i32_0 = arith.constant 0 : i32
    %c0_i32_1 = arith.constant 0 : i32
    return %c0_i32, %c0_i32_0 : i32, i32
  }
  func.func @transform_2(%arg0: i32) -> (i32, i32) {
    %c0_i32 = arith.constant 0 : i32
    %c0_i32_0 = arith.constant 0 : i32
    %c0_i32_1 = arith.constant 0 : i32
    return %c0_i32, %c0_i32_0 : i32, i32
  }
  func.func @transform_3(%arg0: i32) -> (i32, i32, i32) {
    %c0_i32 = arith.constant 0 : i32
    %c0_i32_0 = arith.constant 0 : i32
    %c0_i32_1 = arith.constant 0 : i32
    return %arg0, %c0_i32, %c0_i32_0 : i32, i32, i32
  }
}

</mosaic_0001>

<bundles_post_ra>
// kernel: tpu_custom_call.1
= control target key start
LH: loop header
LB: loop body
LE: loop exit
PB: predicated region body
PF: predicated region fallthrough
CT: control target
= control target key end

     0   :  { %8 = vsyncpa [#allocation3], 0  ;;  %s700_s0 = inlined_call_operand.hbm [shape: f32[2,32,256], index: 0, kind: input, shape index: {}]   ;;  %s701_s1 = inlined_call_operand.hbm [shape: f32[32,2], index: 1, kind: input, shape index: {}]   ;;  %s702_s2 = inlined_call_operand.hbm [shape: f32[2,32], index: 2, kind: input, shape index: {}]   ;;  %s703_s3 = inlined_call_operand.hbm [shape: f32[2,32,256], index: 3, kind: output, shape index: {}]  }
   0x1   :  { %9 = vsyncpa [#allocation6], 0 }
   0x2   :  { %10 = vsyncpa [#allocation4], 0  ;;  %s551_s12 = smov [#allocation5]   ;;  %s457_s16 = scalar_lea.hbm %s701_s1, 512 }
   0x3   :  { %s28_s13 = sshll.u32 %s551_s12, 4  ;;  %p458_p0 = scmp.ne.s32.totalorder %s701_s1, %s457_s16  ;;  %s29_s13 = int_to_ptr.vmem [resolvable:$true] %s28_s13 }
   0x4   :  { %p461_p1 = scmp.lt.u32.totalorder %s457_s16, %s701_s1 }
   0x6   :  { %p463_p2 = pnand %p461_p1, %p458_p0 }
   0x8   :  { %466 = shalt.err (!%p463_p2)
}
   0x9   :  { %s467_s21 = scalar_lea.vmem %s29_s13, 512  ;;  %p472_p4 = scmp.lt.s32.totalorder %s29_s13, %s29_s13 }
   0xa   :  { %p468_p3 = scmp.ne.s32.totalorder %s29_s13, %s467_s21  ;;  %p473_p5 = scmp.lt.s32.totalorder %s467_s21, %s467_s21 }
   0xc   :  { %p474_p6 = por %p473_p5, %p472_p4 }
   0xe   :  { %p475_p7 = pnand %p474_p6, %p468_p3 }
  0x10   :  { %478 = shalt.err (!%p475_p7)
}
  0x11   :  { %s552_s22 = smov 128   ;;  %s553_s23 = smov 8  }
  0x12   :  { %34 = dma.hbm_to_vmem [thread:$0]  %s701_s1, 512, %s29_s13, [#allocation6], %s552_s22, %s552_s22, %s553_s23  }
  0x13   :  { %s554_s26 = smov [#allocation2]   ;;  %s479_s30 = scalar_lea.hbm %s700_s0, 2048 }
  0x14   :  { %s16_s27 = sshll.u32 %s554_s26, 4  ;;  %p480_p8 = scmp.ne.s32.totalorder %s700_s0, %s479_s30  ;;  %s17_s27 = int_to_ptr.vmem [resolvable:$true] %s16_s27 }
  0x15   :  { %p483_p9 = scmp.lt.u32.totalorder %s479_s30, %s700_s0 }
  0x17   :  { %p485_p10 = pnand %p483_p9, %p480_p8 }
  0x19   :  { %488 = shalt.err (!%p485_p10)
}
  0x1a   :  { %s489_s8 = scalar_lea.vmem %s17_s27, 2048  ;;  %p494_p12 = scmp.lt.s32.totalorder %s17_s27, %s17_s27 }
  0x1b   :  { %p490_p11 = scmp.ne.s32.totalorder %s17_s27, %s489_s8  ;;  %p495_p13 = scmp.lt.s32.totalorder %s489_s8, %s489_s8 }
  0x1d   :  { %p496_p0 = por %p495_p13, %p494_p12 }
  0x1f   :  { %p497_p1 = pnand %p496_p0, %p490_p11 }
  0x21   :  { %500 = shalt.err (!%p497_p1)
}
  0x22   :  { %s555_s1 = smov 256   ;;  %s556_s9 = smov 16  }
  0x23   :  { %22 = dma.hbm_to_vmem [thread:$0]  %s700_s0, 2048, %s17_s27, [#allocation3], %s555_s1, %s555_s1, %s556_s9  }
  0x24   :  { %s557_s12 = smov [#allocation7]   ;;  %s501_s16 = scalar_lea.hbm %s702_s2, 32 }
  0x25   :  { %s41_s13 = sshll.u32 %s557_s12, 4  ;;  %p502_p2 = scmp.ne.s32.totalorder %s702_s2, %s501_s16  ;;  %s42_s13 = int_to_ptr.vmem [resolvable:$true] %s41_s13 }
  0x26   :  { %p505_p3 = scmp.lt.u32.totalorder %s501_s16, %s702_s2 }
  0x28   :  { %p507_p4 = pnand %p505_p3, %p502_p2 }
  0x2a   :  { %510 = shalt.err (!%p507_p4)
}
  0x2b   :  { %s511_s21 = scalar_lea.vmem %s42_s13, 32  ;;  %p516_p6 = scmp.lt.s32.totalorder %s42_s13, %s42_s13 }
  0x2c   :  { %p512_p5 = scmp.ne.s32.totalorder %s42_s13, %s511_s21  ;;  %p517_p7 = scmp.lt.s32.totalorder %s511_s21, %s511_s21 }
  0x2e   :  { %p518_p8 = por %p517_p7, %p516_p6 }
  0x30   :  { %p519_p9 = pnand %p518_p8, %p512_p5 }
  0x32   :  { %522 = shalt.err (!%p519_p9)
}
  0x33   :  { %44 = dma.hbm_to_vmem [thread:$0]  %s702_s2, 32, %s42_s13, [#allocation6]  }
  0x34   :  { %545 = dma.done.wait [#allocation3], 2048  }
  0x35   :  { %546 = vsyncadd [#allocation3], 4294965248 }
  0x36   :  { %547 = dma.done.wait [#allocation6], 544  }
  0x37   :  { %548 = vsyncadd [#allocation6], 4294966752  ;;  %v621_v0 = vld [vmem:[#allocation2 + $0x40] sm:$0xff]  ;;  %v623_v1 = vld [vmem:[#allocation2 + $0x48] sm:$0xff]  ;;  %v558_v27 = vmov 0.0|0.0   ;;  %vm559_vm0 = vmmov 0   ;;  %v114_v32 = vlaneseq }
  0x38   :  { %v625_v2 = vld [vmem:[#allocation2] sm:$0xff]  ;;  %v82_v3 = vadd.f32 %v623_v1, %v621_v0  ;;  %v629_v4 = vld [vmem:[#allocation2 + $0x8] sm:$0xff]  ;;  %v631_v5 = vld [vmem:[#allocation2 + $0x50] sm:$0xff]  ;;  %436 = vmatprep.subr.bf16.mxu0 %v558_v27  ;;  %v560_v31 = vmov 0.0   ;;  %vm125_vm1 = vcmask 130112   ;;  %vm132_vm2 = vcmask 195712  }
  0x39   :  { %v633_v6 = vld [vmem:[#allocation2 + $0x58] sm:$0xff]  ;;  %v70_v7 = vadd.f32 %v629_v4, %v625_v2  ;;  %v637_v8 = vld [vmem:[#allocation2 + $0x10] sm:$0xff]  ;;  %v645_v12 = vld [vmem:[#allocation2 + $0x60] sm:$0xff]  ;;  %428 = vmatprep.mubr.msk.f32.mxu0 %vm559_vm0, %v560_v31  ;;  %431 = vmatprep.subr.mxu1 %v560_v31  ;;  %v115_v34 = vand.u32 127, %v114_v32  ;;  %v117_v39 = vshrl.u32 %v114_v32, 7  ;;  %vm139_vm3 = vcmask 261312  }
  0x3a   :  { %v639_v9 = vld [vmem:[#allocation2 + $0x18] sm:$0xff]  ;;  %83 = vadd.xlane.f32.xlu1 %v82_v3  ;;  %v85_v10 = vadd.f32 %v633_v6, %v631_v5  ;;  %v647_v13 = vld [vmem:[#allocation2 + $0x68] sm:$0xff]  ;;  %v649_v14 = vld [vmem:[#allocation2 + $0x20] sm:$0xff]  ;;  %433 = vmatprep.mubr.msk.f32.mxu1 %vm559_vm0, %v560_v31  ;;  %vm160_vm4 = vcmask 1041409   ;;  %vm162_vm5 = vcmask 261120   ;;  %vm241_vm6 = vcmask 1041408  }
  0x3b   :  { %71 = vadd.xlane.f32.xlu0 %v70_v7  ;;  %v73_v11 = vadd.f32 %v639_v9, %v637_v8  ;;  %v651_v15 = vld [vmem:[#allocation2 + $0x28] sm:$0xff]  ;;  %v88_v16 = vadd.f32 %v647_v13, %v645_v12  ;;  %v657_v18 = vld [vmem:[#allocation2 + $0x70] sm:$0xff]  ;;  %v659_v19 = vld [vmem:[#allocation2 + $0x78] sm:$0xff]  ;;  %v120_v36 = vadd.s32 4294967288, %v115_v34  ;;  %v127_v38 = vadd.s32 4294967280, %v115_v34  ;;  %s561_s2 = smov [#allocation8]  }
  0x3c   :  { %v76_v17 = vadd.f32 %v651_v15, %v649_v14  ;;  %v661_v20 = vld [vmem:[#allocation2 + $0x30] sm:$0xff]  ;;  %v663_v21 = vld [vmem:[#allocation2 + $0x38] sm:$0xff]  ;;  %v91_v22 = vadd.f32 %v659_v19, %v657_v18  ;;  %v102_v24 = vld [vmem:[#allocation5] sm:$0xff]  ;;  %v134_v43 = vadd.s32 4294967272, %v115_v34  ;;  %v118_v47 = vsub.s32 %v115_v34, %v117_v39  ;;  %s396_s23 = sshll.u32 %s561_s2, 4  ;;  %s397_s23 = int_to_ptr.vmem [resolvable:$true] %s396_s23 }
  0x3d   :  { %v79_v23 = vadd.f32 %v663_v21, %v661_v20  ;;  %v103_v25 = vld [vmem:[#allocation5 + $0x8] sm:$0xff]  ;;  %v104_v28 = vld [vmem:[#allocation5 + $0x10] sm:$0xff]  ;;  %v105_v29 = vld [vmem:[#allocation5 + $0x18] sm:$0xff]  ;;  %v123_v41 = vsub.s32 %v120_v36, %v117_v39  ;;  %v130_v45 = vsub.s32 %v127_v38, %v117_v39  ;;  %vm237_vm7 = vcmask 15360   ;;  %s523_s24 = scalar_lea.vmem %s397_s23, 2048  ;;  %p528_p11 = scmp.lt.s32.totalorder %s397_s23, %s397_s23 }
  0x3e   :  { %86 = vadd.xlane.f32.xlu1 %v85_v10  ;;  %v437_v26 = vpack.c.bf16 %v103_v25, %v102_v24  ;;  %v440_v30 = vpack.c.bf16 %v105_v29, %v104_v28  ;;  %v137_v54 = vsub.s32 %v134_v43, %v117_v39  ;;  %v236_v25 = vld [vmem:[#allocation7] sm:$0x3]  ;;  %v323_v34 = vsub.s32 0, %v117_v39  ;;  %p524_p10 = scmp.ne.s32.totalorder %s397_s23, %s523_s24  ;;  %p529_p12 = scmp.lt.s32.totalorder %s523_s24, %s523_s24 }
  0x3f   :  { %74 = vadd.xlane.f32.xlu0 %v73_v11  ;;  %432 = vmatpush3.msk.msra.mxu1 %vm241_vm6, %v236_v25 }
  0x40   :  { %438 = vmatpush3.bf16.msra.mxu0 %v437_v26  ;;  %p530_p13 = por %p529_p12, %p528_p11 }
  0x41   :  { %439 = vmatprep.subr.bf16.mxu0 %v558_v27 }
  0x42   :  { %89 = vadd.xlane.f32.xlu1 %v88_v16  ;;  %p531_p0 = pnand %p530_p13, %p524_p10 }
  0x43   :  { %77 = vadd.xlane.f32.xlu0 %v76_v17 }
  0x44   :  { %441 = vmatpush3.bf16.msra.mxu0 %v440_v30 }
  0x46   :  { %92 = vadd.xlane.f32.xlu1 %v91_v22 }
  0x47   :  { %80 = vadd.xlane.f32.xlu0 %v79_v23 }
  0xc7   :  { %v84_v33 = vpop.xlane.xlu1 %83 }
  0xc8   :  { %v72_v35 = vpop.xlane.xlu0 %71  ;;  %v98_v48 = vmul.f32 0.00390625, %v84_v33 }
  0xc9   :  { %v94_v51 = vmul.f32 0.00390625, %v72_v35 }
  0xca   :  { %v144_v58 = vrot.slane %v98_v48, %v118_v47 }
  0xcb   :  { %v87_v37 = vpop.xlane.xlu1 %86  ;;  %v119_v62 = vrot.slane %v94_v51, %v118_v47 }
  0xcc   :  { %v75_v40 = vpop.xlane.xlu0 %74  ;;  %v99_v42 = vmul.f32 0.00390625, %v87_v37  ;;  %v342_v37 = vsub.s32 1, %v117_v39 }
  0xcd   :  { %v95_v44 = vmul.f32 0.00390625, %v75_v40 }
  0xce   :  { %v148_v53 = vrot.slane %v99_v42, %v123_v41 }
  0xcf   :  { %v90_v46 = vpop.xlane.xlu1 %89  ;;  %v124_v55 = vrot.slane %v95_v44, %v123_v41 }
  0xd0   :  { %v100_v49 = vmul.f32 0.00390625, %v90_v46  ;;  %v78_v50 = vpop.xlane.xlu0 %77  ;;  %v149_v3 = vsel %vm125_vm1, %v148_v53, %v144_v58 }
  0xd1   :  { %v96_v52 = vmul.f32 0.00390625, %v78_v50  ;;  %v126_v10 = vsel %vm125_vm1, %v124_v55, %v119_v62 }
  0xd2   :  { %v153_v56 = vrot.slane %v100_v49, %v130_v45 }
  0xd3   :  { %v93_v57 = vpop.xlane.xlu1 %92  ;;  %v131_v59 = vrot.slane %v96_v52, %v130_v45 }
  0xd4   :  { %v101_v60 = vmul.f32 0.00390625, %v93_v57  ;;  %v81_v61 = vpop.xlane.xlu0 %80  ;;  %v154_v11 = vsel %vm132_vm2, %v153_v56, %v149_v3 }
  0xd5   :  { %v97_v63 = vmul.f32 0.00390625, %v81_v61  ;;  %v133_v17 = vsel %vm132_vm2, %v131_v59, %v126_v10 }
  0xd6   :  { %v158_v7 = vrot.slane %v101_v60, %v137_v54 }
  0xd7   :  { %v138_v16 = vrot.slane %v97_v63, %v137_v54 }
  0xd8   :  { %v159_v22 = vsel %vm139_vm3, %v158_v7, %v154_v11 }
  0xd9   :  { %v140_v23 = vsel %vm139_vm3, %v138_v16, %v133_v17 }
  0xda   :  { %v161_v24 = vsel %vm160_vm4, %v159_v22, %v140_v23 }
  0xdb   :  { %429 = vmatmul.mubr.msk.f32.vlgmr.msra.gmra.mrb[0].mxu0 %vm162_vm5, %v161_v24 }
 0x1ae   :  { %v231_v26 = vpop.f32.mrb[0].mxu0 }
 0x1af   :  { %v235_v27 = vmax.f32 %v231_v26, 0.0  ;;  %v430_v28 = vpop.f32.mrb[1].mxu0 }
 0x1b1   :  { %434 = vmatmul.mubr.msk.f32.vlgmr.msra.gmra.mrb[0].mxu1 %vm237_vm7, %v235_v27 }
 0x284   :  { %v311_v29 = vpop.f32.mrb[0].mxu1 }
 0x285   :  { %v412_v30 = vmul.f32 -1.442695, %v311_v29  ;;  %v435_v31 = vpop.f32.mrb[1].mxu1 }
 0x287   :  { %453 = vpow2.f32 %v412_v30 }
 0x291   :  { %v454_v32 = vpop.eup %453 }
 0x292   :  { %v318_v33 = vadd.f32 1.0, %v454_v32 }
 0x294   :  { %455 = vrcp.f32 %v318_v33 }
 0x29e   :  { %v456_v35 = vpop.eup %455 }
 0x29f   :  { %v324_v36 = vrot.slane %v456_v35, %v323_v34  ;;  %v343_v38 = vrot.slane %v456_v35, %v342_v37 }
 0x2a1   :  { %330 = vbcast.lane.b32.xlu1 %v324_v36, 264  ;;  %326 = vbcast.lane.b32.xlu0 %v324_v36, 256 }
 0x2a5   :  { %334 = vbcast.lane.b32.xlu1 %v324_v36, 272  ;;  %345 = vbcast.lane.b32.xlu0 %v343_v38, 256 }
 0x2a9   :  { %338 = vbcast.lane.b32.xlu1 %v324_v36, 280  ;;  %353 = vbcast.lane.b32.xlu0 %v343_v38, 272 }
 0x2ad   :  { %349 = vbcast.lane.b32.xlu1 %v343_v38, 264 }
 0x2b1   :  { %357 = vbcast.lane.b32.xlu1 %v343_v38, 280 }
 0x313   :  { %v331_v40 = vpop.permute.xlu1 %330  ;;  %v327_v41 = vpop.permute.xlu0 %326 }
 0x314   :  { %v361_v42 = vmul.f32 %v331_v40, %v637_v8  ;;  %v362_v43 = vmul.f32 %v331_v40, %v639_v9  ;;  %v359_v44 = vmul.f32 %v327_v41, %v625_v2  ;;  %v360_v45 = vmul.f32 %v327_v41, %v629_v4 }
 0x316   :  { %377 = vst [vmem:[#allocation8 + $0x10] sm:$0xff] %v361_v42  ;;  %378 = vst [vmem:[#allocation8 + $0x18] sm:$0xff] %v362_v43 }
 0x317   :  { %375 = vst [vmem:[#allocation8] sm:$0xff] %v359_v44  ;;  %376 = vst [vmem:[#allocation8 + $0x8] sm:$0xff] %v360_v45  ;;  %v335_v39 = vpop.permute.xlu1 %334  ;;  %v346_v46 = vpop.permute.xlu0 %345 }
 0x318   :  { %v363_v47 = vmul.f32 %v335_v39, %v649_v14  ;;  %v364_v48 = vmul.f32 %v335_v39, %v651_v15  ;;  %v367_v49 = vmul.f32 %v346_v46, %v621_v0  ;;  %v368_v8 = vmul.f32 %v346_v46, %v623_v1 }
 0x31a   :  { %379 = vst [vmem:[#allocation8 + $0x20] sm:$0xff] %v363_v47  ;;  %380 = vst [vmem:[#allocation8 + $0x28] sm:$0xff] %v364_v48 }
 0x31b   :  { %383 = vst [vmem:[#allocation8 + $0x40] sm:$0xff] %v367_v49  ;;  %384 = vst [vmem:[#allocation8 + $0x48] sm:$0xff] %v368_v8  ;;  %v339_v2 = vpop.permute.xlu1 %338  ;;  %v354_v4 = vpop.permute.xlu0 %353 }
 0x31c   :  { %v365_v9 = vmul.f32 %v339_v2, %v661_v20  ;;  %v366_v50 = vmul.f32 %v339_v2, %v663_v21  ;;  %v371_v51 = vmul.f32 %v354_v4, %v645_v12  ;;  %v372_v14 = vmul.f32 %v354_v4, %v647_v13 }
 0x31e   :  { %381 = vst [vmem:[#allocation8 + $0x30] sm:$0xff] %v365_v9  ;;  %382 = vst [vmem:[#allocation8 + $0x38] sm:$0xff] %v366_v50 }
 0x31f   :  { %387 = vst [vmem:[#allocation8 + $0x60] sm:$0xff] %v371_v51  ;;  %388 = vst [vmem:[#allocation8 + $0x68] sm:$0xff] %v372_v14  ;;  %v350_v0 = vpop.permute.xlu1 %349 }
 0x320   :  { %v369_v1 = vmul.f32 %v350_v0, %v631_v5  ;;  %v370_v15 = vmul.f32 %v350_v0, %v633_v6 }
 0x322   :  { %385 = vst [vmem:[#allocation8 + $0x50] sm:$0xff] %v369_v1  ;;  %386 = vst [vmem:[#allocation8 + $0x58] sm:$0xff] %v370_v15 }
 0x323   :  { %v358_v20 = vpop.permute.xlu1 %357 }
 0x324   :  { %v373_v21 = vmul.f32 %v358_v20, %v657_v18  ;;  %v374_v12 = vmul.f32 %v358_v20, %v659_v19 }
 0x326   :  { %389 = vst [vmem:[#allocation8 + $0x70] sm:$0xff] %v373_v21  ;;  %390 = vst [vmem:[#allocation8 + $0x78] sm:$0xff] %v374_v12 }
 0x327   :  { %534 = shalt.err (!%p531_p0)
}
 0x328   :  { %s535_s27 = scalar_lea.hbm %s703_s3, 2048 }
 0x329   :  { %p536_p1 = scmp.ne.s32.totalorder %s703_s3, %s535_s27  ;;  %p539_p2 = scmp.lt.u32.totalorder %s535_s27, %s703_s3 }
 0x32b   :  { %p541_p3 = pnand %p539_p2, %p536_p1 }
 0x32d   :  { %544 = shalt.err (!%p541_p3)
}
 0x32e   :  { %402 = dma.vmem_to_hbm [thread:$0]  %s397_s23, 2048, %s703_s3, [#allocation4], %s555_s1, %s555_s1, %s556_s9  }
 0x32f   :  { %549 = dma.done.wait [#allocation4], 2048  }
 0x330   :  { %550 = vsyncadd [#allocation4], 4294965248 }
 0x331   :  { %406 = vsyncpa [#allocation3], 1 }
 0x332   :  { %407 = vsyncpa [#allocation6], 1 }
 0x333   :  { %408 = vsyncpa [#allocation4], 1 }

</bundles_post_ra>
